<compile_context>
chip_gen: v7x
topology: tpu7x:2x2x1
jax: 0.10.0
libtpu: 0.0.40
codegen_flags: <defaults>
</compile_context>

<pallas_src>
import functools

import jax
import jax.numpy as jnp
from jax.experimental import pallas as pl
from jax.experimental.pallas import tpu as pltpu


def _round_up(n, m):
    return ((n + m - 1) // m) * m


def _patch_embed_kernel(x_ref, w_ref, b_ref, o_ref):
    # x_ref: (tm, Kp) bf16, w_ref: (Kp, Np) bf16, b_ref: (1, Np) f32,
    # o_ref: (tm, Np) f32.  Single MXU matmul per tile, f32 accumulate.
    acc = jnp.dot(x_ref[...], w_ref[...], preferred_element_type=jnp.float32)
    o_ref[...] = (acc + b_ref[...]).astype(o_ref.dtype)


def _rearrange_patches(x, patch_size):
    """einops: 'b c (h p1) (w p2) -> b (h w) (p1 p2 c)'  (pure JAX glue)."""
    B, C, H, W = x.shape
    p = patch_size
    h, w = H // p, W // p
    x = x.reshape(B, C, h, p, w, p)            # b c h p1 w p2
    x = jnp.transpose(x, (0, 2, 4, 3, 5, 1))   # b h w p1 p2 c
    return x.reshape(B, h * w, p * p * C)      # b (h w) (p1 p2 c)


@functools.partial(jax.jit, static_argnames=("patch_size",))
def patch_embedding(x, weight, bias, *, patch_size):
    """x: [B, C, H, W]. weight: [emb, K] (PyTorch nn.Linear layout), bias: [emb].
    Returns [B, num_patches, emb] (f32 accumulation on the MXU)."""
    B, C, H, W = x.shape
    emb, K = weight.shape
    out_dtype = x.dtype

    # ---- patch extraction in bf16 (halves the extra HBM pass) ----
    # TODO(synk): fully fusing the NCHW patch gather into the kernel (strided
    # index maps into x) would remove this materialized pass entirely.
    patches = _rearrange_patches(x.astype(jnp.bfloat16), patch_size)  # [B,P,K]
    P = patches.shape[1]
    M = B * P
    patches2d = patches.reshape(M, K)

    # ---- lane-dense padding: K, emb -> multiples of 128 ----
    Kp = _round_up(K, 128)
    Np = _round_up(emb, 128)

    # ---- M tiling: big tiles, no ragged blocks (pad M instead) ----
    Mp = _round_up(M, 8)
    if Mp <= 512:
        tm = Mp                       # tiny problem: single grid step
    else:
        tm = 512                      # multiple of 128; fills MXU rows
        Mp = _round_up(M, tm)
    grid = (Mp // tm,)

    x2d = jnp.pad(patches2d, ((0, Mp - M), (0, Kp - K)))                  # bf16
    w_t = jnp.pad(weight.T.astype(jnp.bfloat16), ((0, Kp - K), (0, Np - emb)))
    b2d = jnp.pad(bias.astype(jnp.float32), (0, Np - emb)).reshape(1, Np)

    # ---- explicit VMEM budget: double-buffered bf16 blocks + f32 output ----
    est = (2 * tm * Kp * 2          # x tile
           + 2 * Kp * Np * 2        # weight (constant block, still 2x buffered)
           + 2 * Np * 4             # bias
           + 2 * tm * Np * 4)       # output tile (f32)
    vmem_limit = int(min(max(2 * est, 32 * 1024 * 1024), 48 * 1024 * 1024))

    out2d = pl.pallas_call(
        _patch_embed_kernel,
        out_shape=jax.ShapeDtypeStruct((Mp, Np), out_dtype),
        grid_spec=pltpu.PrefetchScalarGridSpec(
            num_scalar_prefetch=0,
            grid=grid,
            in_specs=[
                pl.BlockSpec((tm, Kp), lambda i: (i, 0)),
                pl.BlockSpec((Kp, Np), lambda i: (0, 0)),   # constant block
                pl.BlockSpec((1, Np), lambda i: (0, 0)),    # constant block
            ],
            out_specs=pl.BlockSpec((tm, Np), lambda i: (i, 0)),
        ),
        compiler_params=pltpu.CompilerParams(
            dimension_semantics=("parallel",),
            vmem_limit_bytes=vmem_limit),
    )(x2d, w_t, b2d)

    # Strip M / emb padding and restore [B, num_patches, emb].
    return out2d[:M, :emb].reshape(B, P, emb)


if __name__ == "__main__":
    # Small shapes consistent with the module's forward:
    #   batch=2, in_channels=4, spatial=16x16, patch_size=4 -> 16 patches,
    #   K = 4*4*4 = 64, emb_size = 32.
    B, C, H, W = 2, 4, 16, 16
    patch_size = 4
    emb_size = 32
    K = patch_size * patch_size * C

    key = jax.random.PRNGKey(0)
    kx, kw, kb = jax.random.split(key, 3)

    x = jax.random.normal(kx, (B, C, H, W), dtype=jnp.float32)
    # Deterministic synthetic nn.Linear params (PyTorch layout: [emb, K]).
    bound = 1.0 / (K ** 0.5)
    weight = jax.random.uniform(kw, (emb_size, K), jnp.float32, -bound, bound)
    bias = jax.random.uniform(kb, (emb_size,), jnp.float32, -bound, bound)

    out = patch_embedding(x, weight, bias, patch_size=patch_size)
    out = jax.block_until_ready(out)

    # Pure-JAX f32 reference of the exact PyTorch forward.
    ref = _rearrange_patches(x, patch_size) @ weight.T + bias
    assert out.shape == (B, (H // patch_size) * (W // patch_size), emb_size)
    # bf16 MXU inputs with f32 accumulation -> small, bounded numeric delta.
    assert jnp.allclose(out, ref, atol=3e-2, rtol=3e-2), float(
        jnp.max(jnp.abs(out - ref)))

    print("KERNEL_OK")
</pallas_src>

<mosaic_0001>
module attributes {stable_mosaic.version = 11 : i64} {
  func.func @_patch_embed_kernel(%arg0: i32, %arg1: memref<32x128xbf16, #tpu.memory_space<vmem>>, %arg2: memref<128x128xbf16, #tpu.memory_space<vmem>>, %arg3: memref<1x128xf32, #tpu.memory_space<vmem>>, %arg4: memref<32x128xf32, #tpu.memory_space<vmem>>) attributes {dimension_semantics = [#tpu.dimension_semantics<parallel>], iteration_bounds = array<i64: 1>, scalar_prefetch = 0 : i64, scratch_operands = 0 : i64, tpu.core_type = #tpu.core_type<tc>, window_params = [{transform_indices = @transform_0, window_bounds = array<i64: 32, 128>}, {pipeline_mode = #tpu.pipeline_mode<synchronous>, transform_indices = @transform_1, window_bounds = array<i64: 128, 128>}, {pipeline_mode = #tpu.pipeline_mode<synchronous>, transform_indices = @transform_2, window_bounds = array<i64: 1, 128>}, {transform_indices = @transform_3, window_bounds = array<i64: 32, 128>}]} {
    %c0 = arith.constant 0 : index
    %c0_0 = arith.constant 0 : index
    %0 = vector.load %arg1[%c0, %c0_0] : memref<32x128xbf16, #tpu.memory_space<vmem>>, vector<32x128xbf16>
    %c0_1 = arith.constant 0 : index
    %c0_2 = arith.constant 0 : index
    %1 = vector.load %arg2[%c0_1, %c0_2] : memref<128x128xbf16, #tpu.memory_space<vmem>>, vector<128x128xbf16>
    %cst = arith.constant dense<0.000000e+00> : vector<32x128xf32>
    %2 = tpu.matmul %0, %1, %cst {dimension_numbers = #tpu.dot_dimension_numbers<[1], [0], [0], [1], [0, 0, 1, 1], [], []>} : vector<32x128xbf16>, vector<128x128xbf16>, vector<32x128xf32> -> vector<32x128xf32>
    %c0_3 = arith.constant 0 : index
    %c0_4 = arith.constant 0 : index
    %3 = vector.load %arg3[%c0_3, %c0_4] : memref<1x128xf32, #tpu.memory_space<vmem>>, vector<1x128xf32>
    %4 = vector.broadcast %3 : vector<1x128xf32> to vector<32x128xf32>
    %5 = arith.addf %2, %4 : vector<32x128xf32>
    %c0_5 = arith.constant 0 : index
    %c0_6 = arith.constant 0 : index
    %6 = vector.load %arg4[%c0_5, %c0_6] : memref<32x128xf32, #tpu.memory_space<vmem>>, vector<32x128xf32>
    tpu.vector_store %arg4[%c0_5, %c0_6], %5 {strides = array<i32>} : memref<32x128xf32, #tpu.memory_space<vmem>>, vector<32x128xf32>,
    return
  }
  func.func @transform_0(%arg0: i32) -> (i32, i32) {
    %c0_i32 = arith.constant 0 : i32
    %c0_i32_0 = arith.constant 0 : i32
    return %arg0, %c0_i32 : i32, i32
  }
  func.func @transform_1(%arg0: i32) -> (i32, i32) {
    %c0_i32 = arith.constant 0 : i32
    %c0_i32_0 = arith.constant 0 : i32
    %c0_i32_1 = arith.constant 0 : i32
    return %c0_i32, %c0_i32_0 : i32, i32
  }
  func.func @transform_2(%arg0: i32) -> (i32, i32) {
    %c0_i32 = arith.constant 0 : i32
    %c0_i32_0 = arith.constant 0 : i32
    %c0_i32_1 = arith.constant 0 : i32
    return %c0_i32, %c0_i32_0 : i32, i32
  }
  func.func @transform_3(%arg0: i32) -> (i32, i32) {
    %c0_i32 = arith.constant 0 : i32
    %c0_i32_0 = arith.constant 0 : i32
    return %arg0, %c0_i32 : i32, i32
  }
}

</mosaic_0001>

<bundles_post_ra>
// kernel: patch_embedding.1
= control target key start
LH: loop header
LB: loop body
LE: loop exit
PB: predicated region body
PF: predicated region fallthrough
CT: control target
= control target key end

     0   :  { %s318_s0 = inlined_call_operand.vmem [shape: bf16[32,128], index: 0, kind: input, shape index: {}]   ;;  %s319_s1 = inlined_call_operand.vmem [shape: bf16[128,128], index: 1, kind: input, shape index: {}]   ;;  %s320_s2 = inlined_call_operand.vmem [shape: f32[1,128], index: 2, kind: input, shape index: {}]   ;;  %s321_s3 = inlined_call_operand.hbm [shape: f32[32,128], index: 3, kind: output, shape index: {}]  }
   0x1   :  { %v216_v0 = vld [vmem:[%s319_s1] sm:$0xff]   ;;  %v217_v1 = vld [vmem:[%s319_s1 + $0x8] sm:$0xff]   ;;  %v218_v2 = vld [vmem:[%s319_s1 + $0x10] sm:$0xff]  }
   0x2   :  { %193 = vmatprep.subr.bf16.mxu0 %v216_v0  ;;  %v219_v3 = vld [vmem:[%s319_s1 + $0x18] sm:$0xff]   ;;  %v224_v4 = vld [vmem:[%s318_s0] sm:$0xff]  }
   0x3   :  { %194 = vmatpush3.bf16.msra.mxu0 %v216_v0  ;;  %209 = vmatprep.mubr.bf16.mxu0 %v224_v4 }
   0x4   :  { %195 = vmatprep.subr.bf16.mxu0 %v217_v1 }
   0x7   :  { %196 = vmatpush3.bf16.msra.mxu0 %v217_v1 }
   0x8   :  { %197 = vmatprep.subr.bf16.mxu0 %v218_v2 }
   0x9   :  { %8 = vsyncpa [#allocation3], 0  ;;  %v220_v5 = vld [vmem:[%s319_s1 + $0x20] sm:$0xff]   ;;  %v221_v6 = vld [vmem:[%s319_s1 + $0x28] sm:$0xff]   ;;  %s250_s7 = smov [#allocation2]  }
   0xa   :  { %v222_v7 = vld [vmem:[%s319_s1 + $0x30] sm:$0xff]   ;;  %v223_v8 = vld [vmem:[%s319_s1 + $0x38] sm:$0xff]   ;;  %v225_v9 = vld [vmem:[%s318_s0 + $0x8] sm:$0xff]   ;;  %s161_s8 = sshll.u32 %s250_s7, 4  ;;  %s162_s8 = int_to_ptr.vmem [resolvable:$true] %s161_s8 }
   0xb   :  { %198 = vmatpush3.bf16.msra.mxu0 %v218_v2  ;;  %v172_v10 = vld [vmem:[%s320_s2] ss:$0 sm:$0xff]  ;;  %s226_s0 = scalar_lea.vmem %s162_s8, 512  ;;  %p231_p1 = scmp.lt.s32.totalorder %s162_s8, %s162_s8 }
   0xc   :  { %199 = vmatprep.subr.bf16.mxu0 %v219_v3  ;;  %p227_p0 = scmp.ne.s32.totalorder %s162_s8, %s226_s0  ;;  %p232_p2 = scmp.lt.s32.totalorder %s226_s0, %s226_s0 }
   0xe   :  { %p233_p3 = por %p232_p2, %p231_p1 }
   0xf   :  { %200 = vmatpush3.bf16.msra.mxu0 %v219_v3 }
  0x10   :  { %201 = vmatprep.subr.bf16.mxu0 %v220_v5  ;;  %p234_p4 = pnand %p233_p3, %p227_p0 }
  0x13   :  { %202 = vmatpush3.bf16.msra.mxu0 %v220_v5 }
  0x14   :  { %203 = vmatprep.subr.bf16.mxu0 %v221_v6 }
  0x17   :  { %204 = vmatpush3.bf16.msra.mxu0 %v221_v6 }
  0x18   :  { %205 = vmatprep.subr.bf16.mxu0 %v222_v7 }
  0x1b   :  { %206 = vmatpush3.bf16.msra.mxu0 %v222_v7 }
  0x1c   :  { %207 = vmatprep.subr.bf16.mxu0 %v223_v8 }
  0x1f   :  { %208 = vmatpush3.bf16.msra.mxu0 %v223_v8 }
  0x22   :  { %210 = vmatmul.mubr.bf16.vlgmr.msra.gmra.mrb[0].mxu0 %v225_v9 }
  0xf5   :  { %v211_v11 = vpop.f32.mrb[0].mxu0 }
  0xf6   :  { %v146_v12 = vadd.f32 %v211_v11, %v172_v10  ;;  %v137_v13 = vpop.f32.mrb[1].mxu0 }
  0xf7   :  { %v138_v14 = vadd.f32 %v172_v10, %v137_v13  ;;  %v212_v15 = vpop.f32.mrb[2].mxu0 }
  0xf8   :  { %154 = vst [vmem:[#allocation2 + $0x10] sm:$0xff] %v146_v12  ;;  %v149_v16 = vadd.f32 %v212_v15, %v172_v10  ;;  %v140_v17 = vpop.f32.mrb[3].mxu0 }
  0xf9   :  { %152 = vst [vmem:[#allocation2] sm:$0xff] %v138_v14  ;;  %v141_v18 = vadd.f32 %v172_v10, %v140_v17 }
  0xfa   :  { %155 = vst [vmem:[#allocation2 + $0x18] sm:$0xff] %v149_v16 }
  0xfb   :  { %153 = vst [vmem:[#allocation2 + $0x8] sm:$0xff] %v141_v18 }
  0xfc   :  { %237 = shalt.err (!%p234_p4)
}
  0xfd   :  { %s238_s9 = scalar_lea.hbm %s321_s3, 512 }
  0xfe   :  { %p239_p5 = scmp.ne.s32.totalorder %s321_s3, %s238_s9  ;;  %p242_p6 = scmp.lt.u32.totalorder %s238_s9, %s321_s3 }
 0x100   :  { %p244_p7 = pnand %p242_p6, %p239_p5 }
 0x102   :  { %247 = shalt.err (!%p244_p7)
}
 0x103   :  { %s251_s14 = smov 128   ;;  %s252_s15 = smov 8  }
 0x104   :  { %167 = dma.vmem_to_hbm [thread:$0]  %s162_s8, 512, %s321_s3, [#allocation3], %s251_s14, %s251_s14, %s252_s15  }
 0x105   :  { %248 = dma.done.wait [#allocation3], 512  }
 0x106   :  { %249 = vsyncadd [#allocation3], 4294966784 }
 0x107   :  { %171 = vsyncpa [#allocation3], 1 }

</bundles_post_ra>
